<compile_context>
chip_gen: v5e
topology: v5e:2x2
jax: 0.10.0
libtpu: 0.0.40
codegen_flags: <defaults>
</compile_context>

<pallas_src>
import math
import functools

import jax
import jax.numpy as jnp
from jax import lax
from jax.experimental import pallas as pl
from jax.experimental.pallas import tpu as pltpu


def arc_kernel(x_ref, wt_ref, lab_ref, o_ref, *, s, cos_m, sin_m, th, mm, tile_n):
    x = x_ref[...]                       # (B, K) f32, resident across all tiles
    wt = wt_ref[...]                     # (K, TILE_N) f32, pre-transposed weight tile

    # F.normalize(weight, dim=1) on the original (N, K) layout == L2-normalize
    # each class column of the (K, N) transposed weight.  rsqrt goes to the EUP
    # (its own VLIW slot); clamp sum-of-squares at 1e-24 == max(||w||, 1e-12).
    sumsq = jnp.sum(wt * wt, axis=0, keepdims=True)           # (1, TILE_N)
    w_n = wt * lax.rsqrt(jnp.maximum(sumsq, 1e-24))

    # cos_th = x @ w_norm : native (B,K)@(K,TILE_N) MXU matmul, no transpose.
    cos_th = jnp.dot(x, w_n, preferred_element_type=jnp.float32)   # (B, TILE_N)
    cos_th = jnp.clip(cos_th, -1.0, 1.0)

    sin_th = jnp.sqrt(1.0 - cos_th * cos_th)
    cos_th_m = cos_th * cos_m - sin_th * sin_m
    # torch.where(cos_th > th, cos_th_m, cos_th - mm); the subsequent boolean
    # mask assignment in the PyTorch code applies the identical condition.
    cos_th_m = jnp.where(cos_th > th, cos_th_m, cos_th - mm)

    # one-hot(labels) selection as a single vselect against the global column
    # index of this tile (scatter_ equivalent).
    labels = lab_ref[...]                                     # (B, 1) int32
    col = (lax.broadcasted_iota(jnp.int32, cos_th.shape, 1)
           + pl.program_id(0) * tile_n)
    out = jnp.where(col == labels, cos_th_m, cos_th)
    o_ref[...] = (out * s).astype(o_ref.dtype)


def _pick_tile_n(B, K, N):
    """Largest lane-dense class tile whose working set fits a conservative VMEM
    budget (safe on v7x's 64 MiB physical / 32 MiB default-scoped VMEM while
    still large on v5e/v6e)."""
    budget = 24 * 1024 * 1024
    n_ceil = max(N, 128)
    for t in (16384, 8192, 4096, 2048, 1024, 512, 256, 128):
        if t > n_ceil:
            continue
        # 2x double-buffered weight tile + 2x output tile + resident x + labels
        need = 2 * K * t * 4 + 2 * B * t * 4 + B * K * 4 + B * 128 * 4
        if need <= budget:
            return t
    return 128


def arc_module_forward(inputs, weight, labels, *, s=10.0, m=0.1, tile_n=None):
    """JAX/Pallas equivalent of ArcModule.forward(inputs, labels)."""
    B, K = inputs.shape
    N, Kw = weight.shape
    assert K == Kw

    if labels.ndim == 1:
        labels = labels[:, None]
    labels = labels.astype(jnp.int32)

    cos_m = math.cos(m)
    sin_m = math.sin(m)
    th = math.cos(math.pi - m)
    mm = math.sin(math.pi - m) * m

    if tile_n is None:
        tile_n = _pick_tile_n(B, K, N)

    # One-time transpose in the wrapper: kernel sees the MXU-native (K, N) layout.
    w_t = jnp.transpose(weight)                               # (K, N)

    # Pad the class dim to a multiple of the tile; padded (all-zero) columns
    # produce zeros and are sliced off below.
    n_pad = pl.cdiv(N, tile_n) * tile_n
    if n_pad != N:
        w_t = jnp.pad(w_t, ((0, 0), (0, n_pad - N)))

    kernel = functools.partial(
        arc_kernel, s=float(s), cos_m=cos_m, sin_m=sin_m, th=th, mm=mm,
        tile_n=tile_n,
    )

    # VMEM limit: double-buffered weight + output tiles + residents, with headroom.
    per_step = 2 * K * tile_n * 4 + 2 * B * tile_n * 4 + B * K * 4 + B * 128 * 4
    vmem_limit = int(min(48 * 1024 * 1024, per_step + 4 * 1024 * 1024))

    out = pl.pallas_call(
        kernel,
        out_shape=jax.ShapeDtypeStruct((B, n_pad), jnp.float32),
        grid=(n_pad // tile_n,),
        in_specs=[
            # x: tiny, fully resident (constant block index -> single DMA).
            pl.BlockSpec((B, K), lambda j: (0, 0)),
            # weight tiles streamed along the class dim (double-buffered).
            pl.BlockSpec((K, tile_n), lambda j: (0, j)),
            # labels: constant block index -> DMA'd once, stays resident.
            pl.BlockSpec((B, 1), lambda j: (0, 0)),
        ],
        out_specs=pl.BlockSpec((B, tile_n), lambda j: (0, j)),
        compiler_params=pltpu.CompilerParams(
            dimension_semantics=("parallel",),
            vmem_limit_bytes=vmem_limit,
        ),
        cost_estimate=pl.CostEstimate(
            flops=2 * B * n_pad * K,
            transcendentals=B * n_pad + n_pad,
            bytes_accessed=4 * (K * n_pad + B * K + B * n_pad),
        ),
    )(inputs, w_t, labels)

    if n_pad != N:
        out = out[:, :N]
    return out


def arc_module_reference(inputs, weight, labels, *, s=10.0, m=0.1):
    """Pure-JAX reference for correctness checking."""
    cos_m, sin_m = math.cos(m), math.sin(m)
    th = math.cos(math.pi - m)
    mm = math.sin(math.pi - m) * m
    w_n = weight / jnp.maximum(
        jnp.sqrt(jnp.sum(weight * weight, axis=1, keepdims=True)), 1e-12
    )
    cos_th = jnp.clip(inputs @ w_n.T, -1.0, 1.0)
    sin_th = jnp.sqrt(1.0 - cos_th ** 2)
    cos_th_m = cos_th * cos_m - sin_th * sin_m
    cos_th_m = jnp.where(cos_th > th, cos_th_m, cos_th - mm)
    onehot = jax.nn.one_hot(labels, weight.shape[0], dtype=jnp.float32)
    return (onehot * cos_th_m + (1.0 - onehot) * cos_th) * s


if __name__ == "__main__":
    s, m = 10.0, 0.1
    key = jax.random.PRNGKey(0)

    # Small shapes consistent with the module: batch=8, in_features=32, out_features=128
    B, IN_F, OUT_F = 8, 32, 128
    kx, kw, kl = jax.random.split(key, 3)
    xavier_std = math.sqrt(2.0 / (IN_F + OUT_F))
    weight = xavier_std * jax.random.normal(kw, (OUT_F, IN_F), dtype=jnp.float32)
    inputs = jax.random.normal(kx, (B, IN_F), dtype=jnp.float32)
    labels = jax.random.randint(kl, (B,), 0, OUT_F, dtype=jnp.int32)

    out = jax.block_until_ready(arc_module_forward(inputs, weight, labels, s=s, m=m))
    ref = arc_module_reference(inputs, weight, labels, s=s, m=m)
    assert out.shape == (B, OUT_F)
    assert jnp.allclose(out, ref, atol=1e-4, rtol=1e-4), "mismatch vs reference"

    # Also exercise the tiled / padded path (class count not a tile multiple).
    OUT_F2 = 200
    kw2, kl2 = jax.random.split(kl)
    xavier_std2 = math.sqrt(2.0 / (IN_F + OUT_F2))
    weight2 = xavier_std2 * jax.random.normal(kw2, (OUT_F2, IN_F), dtype=jnp.float32)
    labels2 = jax.random.randint(kl2, (B,), 0, OUT_F2, dtype=jnp.int32)
    out2 = jax.block_until_ready(
        arc_module_forward(inputs, weight2, labels2, s=s, m=m, tile_n=128)
    )
    ref2 = arc_module_reference(inputs, weight2, labels2, s=s, m=m)
    assert out2.shape == (B, OUT_F2)
    assert jnp.allclose(out2, ref2, atol=1e-4, rtol=1e-4), "mismatch vs reference (tiled)"

    print("KERNEL_OK")
</pallas_src>

<mosaic_0001>
module attributes {stable_mosaic.version = 11 : i64} {
  func.func @arc_kernel(%arg0: i32, %arg1: memref<8x32xf32, #tpu.memory_space<vmem>>, %arg2: memref<32x128xf32, #tpu.memory_space<vmem>>, %arg3: memref<8x1xi32, #tpu.memory_space<vmem>>, %arg4: memref<8x128xf32, #tpu.memory_space<vmem>>) attributes {dimension_semantics = [#tpu.dimension_semantics<parallel>], iteration_bounds = array<i64: 1>, scalar_prefetch = 0 : i64, scratch_operands = 0 : i64, tpu.core_type = #tpu.core_type<tc>, window_params = [{pipeline_mode = #tpu.pipeline_mode<synchronous>, transform_indices = @transform_0, window_bounds = array<i64: 8, 32>}, {transform_indices = @transform_1, window_bounds = array<i64: 32, 128>}, {pipeline_mode = #tpu.pipeline_mode<synchronous>, transform_indices = @transform_2, window_bounds = array<i64: 8, 1>}, {transform_indices = @transform_3, window_bounds = array<i64: 8, 128>}]} {
    %c0 = arith.constant 0 : index
    %c0_0 = arith.constant 0 : index
    %0 = vector.load %arg1[%c0, %c0_0] : memref<8x32xf32, #tpu.memory_space<vmem>>, vector<8x32xf32>
    %c0_1 = arith.constant 0 : index
    %c0_2 = arith.constant 0 : index
    %1 = vector.load %arg2[%c0_1, %c0_2] : memref<32x128xf32, #tpu.memory_space<vmem>>, vector<32x128xf32>
    %2 = arith.mulf %1, %1 : vector<32x128xf32>
    %cst = arith.constant dense<0.000000e+00> : vector<128xf32>
    %3 = vector.multi_reduction <add>, %2, %cst [0] : vector<32x128xf32> to vector<128xf32>
    %4 = vector.shape_cast %3 : vector<128xf32> to vector<1x128xf32>
    %cst_3 = arith.constant 1.000000e-24 : f32
    %5 = vector.broadcast %cst_3 : f32 to vector<1x128xf32>
    %6 = arith.maximumf %4, %5 : vector<1x128xf32>
    %7 = math.rsqrt %6 : vector<1x128xf32>
    %8 = vector.broadcast %7 : vector<1x128xf32> to vector<32x128xf32>
    %9 = arith.mulf %1, %8 : vector<32x128xf32>
    %cst_4 = arith.constant dense<0.000000e+00> : vector<8x128xf32>
    %10 = tpu.matmul %0, %9, %cst_4 {dimension_numbers = #tpu.dot_dimension_numbers<[1], [0], [0], [1], [0, 0, 1, 1], [], []>} : vector<8x32xf32>, vector<32x128xf32>, vector<8x128xf32> -> vector<8x128xf32>
    %cst_5 = arith.constant -1.000000e+00 : f32
    %cst_6 = arith.constant 1.000000e+00 : f32
    %11 = vector.broadcast %cst_5 : f32 to vector<8x128xf32>
    %12 = arith.maximumf %11, %10 : vector<8x128xf32>
    %13 = vector.broadcast %cst_6 : f32 to vector<8x128xf32>
    %14 = arith.minimumf %13, %12 : vector<8x128xf32>
    %15 = arith.mulf %14, %14 : vector<8x128xf32>
    %cst_7 = arith.constant 1.000000e+00 : f32
    %16 = vector.broadcast %cst_7 : f32 to vector<8x128xf32>
    %17 = arith.subf %16, %15 : vector<8x128xf32>
    %18 = math.sqrt %17 : vector<8x128xf32>
    %cst_8 = arith.constant 0.995004177 : f32
    %19 = vector.broadcast %cst_8 : f32 to vector<8x128xf32>
    %20 = arith.mulf %14, %19 : vector<8x128xf32>
    %cst_9 = arith.constant 0.0998334139 : f32
    %21 = vector.broadcast %cst_9 : f32 to vector<8x128xf32>
    %22 = arith.mulf %18, %21 : vector<8x128xf32>
    %23 = arith.subf %20, %22 : vector<8x128xf32>
    %cst_10 = arith.constant -0.995004177 : f32
    %24 = vector.broadcast %cst_10 : f32 to vector<8x128xf32>
    %25 = arith.cmpf ogt, %14, %24 : vector<8x128xf32>
    %cst_11 = arith.constant 0.0099833412 : f32
    %26 = vector.broadcast %cst_11 : f32 to vector<8x128xf32>
    %27 = arith.subf %14, %26 : vector<8x128xf32>
    %28 = arith.select %25, %23, %27 : vector<8x128xi1>, vector<8x128xf32>
    %c0_12 = arith.constant 0 : index
    %c0_13 = arith.constant 0 : index
    %29 = vector.load %arg3[%c0_12, %c0_13] : memref<8x1xi32, #tpu.memory_space<vmem>>, vector<8x1xi32>
    %30 = tpu.iota {dimensions = array<i32: 1>} : vector<8x128xi32>
    %c128_i32 = arith.constant 128 : i32
    %31 = arith.muli %arg0, %c128_i32 : i32
    %32 = vector.broadcast %31 : i32 to vector<8x128xi32>
    %33 = arith.addi %30, %32 : vector<8x128xi32>
    %34 = vector.broadcast %29 : vector<8x1xi32> to vector<8x128xi32>
    %35 = arith.cmpi eq, %33, %34 : vector<8x128xi32>
    %36 = arith.select %35, %28, %14 : vector<8x128xi1>, vector<8x128xf32>
    %cst_14 = arith.constant 1.000000e+01 : f32
    %37 = vector.broadcast %cst_14 : f32 to vector<8x128xf32>
    %38 = arith.mulf %36, %37 : vector<8x128xf32>
    %c0_15 = arith.constant 0 : index
    %c0_16 = arith.constant 0 : index
    %39 = vector.load %arg4[%c0_15, %c0_16] : memref<8x128xf32, #tpu.memory_space<vmem>>, vector<8x128xf32>
    tpu.vector_store %arg4[%c0_15, %c0_16], %38 {strides = array<i32>} : memref<8x128xf32, #tpu.memory_space<vmem>>, vector<8x128xf32>,
    return
  }
  func.func @transform_0(%arg0: i32) -> (i32, i32) {
    %c0_i32 = arith.constant 0 : i32
    %c0_i32_0 = arith.constant 0 : i32
    %c0_i32_1 = arith.constant 0 : i32
    return %c0_i32, %c0_i32_0 : i32, i32
  }
  func.func @transform_1(%arg0: i32) -> (i32, i32) {
    %c0_i32 = arith.constant 0 : i32
    %c0_i32_0 = arith.constant 0 : i32
    return %c0_i32, %arg0 : i32, i32
  }
  func.func @transform_2(%arg0: i32) -> (i32, i32) {
    %c0_i32 = arith.constant 0 : i32
    %c0_i32_0 = arith.constant 0 : i32
    %c0_i32_1 = arith.constant 0 : i32
    return %c0_i32, %c0_i32_0 : i32, i32
  }
  func.func @transform_3(%arg0: i32) -> (i32, i32) {
    %c0_i32 = arith.constant 0 : i32
    %c0_i32_0 = arith.constant 0 : i32
    return %c0_i32, %arg0 : i32, i32
  }
}

</mosaic_0001>

<bundles_post_ra>
// kernel: tpu_custom_call.1
= control target key start
LH: loop header
LB: loop body
LE: loop exit
PB: predicated region body
PF: predicated region fallthrough
CT: control target
= control target key end

     0   :  { %8 = vsyncpa [#allocation3], 0  ;;  %s242_s0 = inlined_call_operand.vmem [shape: f32[8,32], index: 0, kind: input, shape index: {}]   ;;  %s243_s1 = inlined_call_operand.hbm [shape: f32[32,128], index: 1, kind: input, shape index: {}]   ;;  %s244_s2 = inlined_call_operand.vmem [shape: s32[8,1], index: 2, kind: input, shape index: {}]   ;;  %s245_s3 = inlined_call_operand.hbm [shape: f32[8,128], index: 3, kind: output, shape index: {}]  }
   0x1   :  { %9 = vsyncpa [#allocation4], 0  ;;  %s16_s14 = sshll.u32 %s243_s1, 4  ;;  %s205_s15 = smov [#allocation2]   ;;  %s17_s14 = int_to_ptr.hbm [resolvable:$true] %s16_s14 }
   0x2   :  { %s18_s16 = sshll.u32 %s205_s15, 4  ;;  %s206_s17 = smov 128   ;;  %s19_s16 = int_to_ptr.vmem [resolvable:$true] %s18_s16 }
   0x3   :  { %s207_s18 = smov 8  }
   0x4   :  { %24 = dma.hbm_to_vmem [thread:$0]  %s17_s14, 512, %s19_s16, [#allocation3], %s206_s17, %s206_s17, %s207_s18  }
   0x5   :  { %201 = dma.done.wait [#allocation3], 512  }
   0x6   :  { %202 = vsyncadd [#allocation3], 4294966784  ;;  %v32_v0 = vld [vmem:[#allocation2] sm:$0xff]  ;;  %v33_v1 = vld [vmem:[#allocation2 + $0x8] sm:$0xff]  ;;  %v208_v18 = vmov 0   ;;  %vm64_vm3 = vcmask 261120   ;;  %v111_v41 = vlaneseq }
   0x7   :  { %v34_v2 = vld [vmem:[#allocation2 + $0x10] sm:$0xff]  ;;  %v35_v3 = vld [vmem:[#allocation2 + $0x18] sm:$0xff]  ;;  %v36_v4 = vmul.f32 %v32_v0, %v32_v0  ;;  %v37_v5 = vmul.f32 %v33_v1, %v33_v1  ;;  %v110_v16 = vld [vmem:[%s244_s2] sm:$0xff]  ;;  %148 = vset.pattern.permute.xlu0 %v208_v18  ;;  %s130_s24 = sshll.u32 %s245_s3, 4  ;;  %s131_s24 = int_to_ptr.hbm [resolvable:$true] %s130_s24 }
   0x8   :  { %v38_v6 = vmul.f32 %v34_v2, %v34_v2  ;;  %v39_v7 = vmul.f32 %v35_v3, %v35_v3  ;;  %117 = vperm.xlu0 %148, %v110_v16   ;;  %v31_v31 = vld [vmem:[%s242_s0] sm:$0xff]  ;;  %v112_v45 = vand.u32 127, %v111_v41  ;;  %s209_s0 = smov [#allocation5]  }
   0x9   :  { %v40_v8 = vadd.f32 %v37_v5, %v36_v4  ;;  %s128_s21 = sshll.u32 %s209_s0, 4  ;;  %s129_s21 = int_to_ptr.vmem [resolvable:$true] %s128_s21 }
   0xb   :  { %v41_v9 = vadd.f32 %v40_v8, %v38_v6 }
   0xd   :  { %v42_v10 = vadd.f32 %v41_v9, %v39_v7 }
   0xf   :  { %v43_v11 = vrot.slane %v42_v10, 4 }
  0x11   :  { %v44_v12 = vadd.f32 %v43_v11, %v42_v10 }
  0x13   :  { %v45_v13 = vrot.slane %v44_v12, 2 }
  0x15   :  { %v46_v14 = vadd.f32 %v45_v13, %v44_v12 }
  0x17   :  { %v47_v15 = vrot.slane %v46_v14, 1 }
  0x19   :  { %v48_v17 = vadd.f32 %v47_v15, %v46_v14 }
  0x1b   :  { %v49_v19 = vmax.f32 %v48_v17, 1e-24 }
  0x1d   :  { %149 = vrsqrt.f32 %v49_v19  ;;  %vm56_vm0 = vweird.f32 %v49_v19 }
  0x23   :  { %v150_v20 = vpop.eup %149 }
  0x24   :  { %v51_v21 = vmul.f32 %v150_v20, %v49_v19  ;;  %vm57_vm1 = vweird.f32 %v150_v20 }
  0x25   :  { %vm58_vm2 = vmor %vm56_vm0, %vm57_vm1 }
  0x26   :  { %v52_v22 = vmul.f32 %v150_v20, %v51_v21 }
  0x28   :  { %v53_v23 = vmul.f32 0.5, %v52_v22 }
  0x2a   :  { %v54_v24 = vsub.f32 1.5, %v53_v23 }
  0x2c   :  { %v55_v25 = vmul.f32 %v150_v20, %v54_v24 }
  0x2e   :  { %v59_v26 = vsel %vm58_vm2, %v150_v20, %v55_v25 }
  0x2f   :  { %v63_v27 = vmul.f32 %v59_v26, %v35_v3  ;;  %v62_v28 = vmul.f32 %v59_v26, %v34_v2  ;;  %v61_v29 = vmul.f32 %v59_v26, %v33_v1  ;;  %v60_v30 = vmul.f32 %v59_v26, %v32_v0 }
  0x31   :  { %80 = vmatpush.msra.mxu0 %v63_v27 }
  0x33   :  { %81 = vmatpush.msra.mxu0 %v62_v28 }
  0x35   :  { %82 = vmatpush.msra.mxu0 %v61_v29 }
  0x37   :  { %83 = vmatpush.msra.mxu0 %v60_v30 }
  0x38   :  { %140 = vmatmul.msk.f32.vlgmr.msra.gmra.mxu0 %vm64_vm3, %v31_v31 }
  0x7a   :  { %v118_v47 = vpop.permute.xlu0 %117 }
  0x7b   :  { %vm119_vm6 = vcmp.eq.s32.totalorder %v112_v45, %v118_v47 }
  0xb5   :  { %v85_v32 = vpop.f32.mrf.mxu0 }
  0xb6   :  { %v141_v33 = vclamps-f32 %v85_v32, 1.0 }
  0xb8   :  { %v90_v34 = vmul.f32 %v141_v33, %v141_v33  ;;  %v104_v49 = vmul.f32 0.9950042, %v141_v33  ;;  %v142_v52 = vadd.f32 -0.009983341, %v141_v33  ;;  %vm107_vm7 = vcmp.gt.f32.partialorder %v141_v33, -0.9950042 }
  0xba   :  { %v91_v35 = vsub.f32 1.0, %v90_v34 }
  0xbc   :  { %151 = vrsqrt.f32 %v91_v35  ;;  %vm99_vm4 = vcmp.eq.f32.partialorder %v91_v35, inf  ;;  %v102_v44 = vand.u32 2147483648, %v91_v35  ;;  %vm101_vm5 = vcmp.eq.f32.partialorder %v91_v35, 0.0 }
  0xc2   :  { %v152_v36 = vpop.eup %151 }
  0xc3   :  { %v93_v37 = vmul.f32 %v152_v36, %v91_v35 }
  0xc5   :  { %v94_v38 = vmul.f32 %v152_v36, %v93_v37 }
  0xc7   :  { %v95_v39 = vmul.f32 0.5, %v94_v38 }
  0xc9   :  { %v96_v40 = vsub.f32 1.5, %v95_v39 }
  0xcb   :  { %v97_v42 = vmul.f32 %v152_v36, %v96_v40 }
  0xcd   :  { %v98_v43 = vmul.f32 %v97_v42, %v91_v35 }
  0xcf   :  { %v100_v46 = vsel %vm99_vm4, %v91_v35, %v98_v43 }
  0xd0   :  { %v103_v48 = vsel %vm101_vm5, %v102_v44, %v100_v46 }
  0xd1   :  { %v105_v50 = vmul.f32 0.099833414, %v103_v48 }
  0xd3   :  { %v106_v51 = vsub.f32 %v104_v49, %v105_v50 }
  0xd5   :  { %v109_v53 = vsel %vm107_vm7, %v106_v51, %v142_v52 }
  0xd6   :  { %v120_v54 = vsel %vm119_vm6, %v109_v53, %v141_v33 }
  0xd7   :  { %v121_v55 = vmul.f32 10.0, %v120_v54 }
  0xd9   :  { %122 = vst [vmem:[#allocation5] sm:$0xff] %v121_v55 }
  0xda   :  { %133 = dma.vmem_to_hbm [thread:$0]  %s129_s21, 128, %s131_s24, [#allocation4]  }
  0xdb   :  { %203 = dma.done.wait [#allocation4], 128  }
  0xdc   :  { %204 = vsyncadd [#allocation4], 4294967168 }
  0xdd   :  { %138 = vsyncpa [#allocation3], 1 }
  0xde   :  { %139 = vsyncpa [#allocation4], 1 }

</bundles_post_ra>
